<compile_context>
chip_gen: v5e
topology: v5e:2x2
jax: 0.10.0
libtpu: 0.0.40
codegen_flags: <defaults>
</compile_context>

<pallas_src>
import functools

import jax
import jax.numpy as jnp
from jax.experimental import pallas as pl
from jax.experimental.pallas import tpu as pltpu

LN_EPS = 1e-5


def _layernorm(x, gamma, beta):
    mu = jnp.mean(x, axis=-1, keepdims=True)
    var = jnp.mean((x - mu) ** 2, axis=-1, keepdims=True)
    return (x - mu) * jax.lax.rsqrt(var + LN_EPS) * gamma + beta


def nmr_encoder_kernel(
    x_ref,        # (tm, 4)  packed rows: [h_shift, c_shift, h_mask, c_mask]
    scal_ref,     # SMEM (6,) f32: [Var(w1),Cov(w1,b1),Var(b1)] per branch
    brv_ref,      # (6, H/4) f32: [(w1-mw)*g, (b1-mb)*g, beta] per branch
    w_ref,        # (2, H/4, H) bf16: folded weights  w2_x @ Wf_half
    fus_ref,      # (5, H) f32: [b2_h@Wf_top, b2_c@Wf_bot, fb, fgamma, fbeta]
    out_ref,      # (tm, H)
):
    rows = x_ref[...]                                  # (tm, 4) f32
    h, c = rows[:, 0:1], rows[:, 1:2]
    hm, cm = rows[:, 2:3], rows[:, 3:4]

    # ---- branch Linear(1->H/4) + LayerNorm + ReLU, closed-form LN stats ----
    # x_i = s*w1_i + b1_i  =>  x_i - mean = s*dw_i + db_i
    #                          var = s^2*Var(w1) + 2s*Cov(w1,b1) + Var(b1)
    def branch(s, base, voff):
        dwg = brv_ref[base + 0:base + 1, :]            # (1, H4)  dw * gamma
        dbg = brv_ref[base + 1:base + 2, :]            # (1, H4)  db * gamma
        beta = brv_ref[base + 2:base + 3, :]           # (1, H4)
        vw = scal_ref[voff]
        cv = scal_ref[voff + 1]
        vb = scal_ref[voff + 2]
        var = s * s * vw + 2.0 * s * cv + vb           # (tm, 1)
        inv = jax.lax.rsqrt(var + LN_EPS)
        return jnp.maximum((s * dwg + dbg) * inv + beta, 0.0)   # (tm, H4)

    xh = branch(h, 0, 0) * hm                          # mask folded pre-matmul
    xc = branch(c, 3, 3) * cm

    # ---- branch Linear2 + mask + concat + fusion Linear: two MXU matmuls ---
    acc = jnp.dot(xh.astype(jnp.bfloat16), w_ref[0],
                  preferred_element_type=jnp.float32)
    acc = acc + jnp.dot(xc.astype(jnp.bfloat16), w_ref[1],
                        preferred_element_type=jnp.float32)
    # masked branch biases (pushed through the fusion weight) + fusion bias
    acc = acc + hm * fus_ref[0:1, :] + cm * fus_ref[1:2, :] + fus_ref[2:3, :]

    # ---- fusion LayerNorm + ReLU -------------------------------------------
    fused = jnp.maximum(_layernorm(acc, fus_ref[3:4, :], fus_ref[4:5, :]), 0.0)
    out_ref[...] = fused.astype(out_ref.dtype)


def init_params(key, hidden_dim):
    """Deterministic parameter init (shapes match the PyTorch module)."""
    h4, h2 = hidden_dim // 4, hidden_dim // 2
    ks = jax.random.split(key, 10)

    def lin(k, fan_in, fan_out):
        bound = 1.0 / jnp.sqrt(fan_in)
        kw, kb = jax.random.split(k)
        w = jax.random.uniform(kw, (fan_in, fan_out), jnp.float32, -bound, bound)
        b = jax.random.uniform(kb, (1, fan_out), jnp.float32, -bound, bound)
        return w, b

    def branch_params(k0, k1):
        w1, b1 = lin(k0, 1, h4)
        g1 = jnp.ones((1, h4), jnp.float32)
        be1 = jnp.zeros((1, h4), jnp.float32)
        w2, b2 = lin(k1, h4, h2)
        return dict(w1=w1, b1=b1, g1=g1, be1=be1, w2=w2, b2=b2)

    hparams = branch_params(ks[0], ks[1])
    cparams = branch_params(ks[2], ks[3])
    fw, fb = lin(ks[4], hidden_dim, hidden_dim)
    fusion = dict(w=fw, b=fb,
                  g=jnp.ones((1, hidden_dim), jnp.float32),
                  be=jnp.zeros((1, hidden_dim), jnp.float32))
    return hparams, cparams, fusion


@functools.partial(jax.jit, static_argnames=("hidden_dim", "tm", "out_dtype"))
def nmr_encoder(h_shifts, c_shifts, h_mask, c_mask, params, hidden_dim,
                tm=1024, out_dtype=jnp.bfloat16):
    assert hidden_dim % 4 == 0
    hparams, cparams, fusion = params
    B, A = h_shifts.shape
    H = hidden_dim
    H2, H4 = H // 2, H // 4
    n_rows = B * A

    # ---- row tiling: large tiles, but keep grid >= 2 for v7x megacore ------
    unit = 8
    tm_req = max(unit, (tm // unit) * unit)
    n_unit = pl.cdiv(n_rows, unit) * unit
    if n_unit >= 2 * unit:
        cap = pl.cdiv(n_unit, 2 * unit) * unit     # >= 2 tiles of work
        tm_eff = min(tm_req, cap)
    else:
        tm_eff = n_unit
    n_pad = pl.cdiv(n_rows, tm_eff) * tm_eff
    pad = n_pad - n_rows
    grid = n_pad // tm_eff

    # ---- pack the four per-row scalars into one (rows, 4) array ------------
    packed = jnp.stack(
        [h_shifts.reshape(-1), c_shifts.reshape(-1),
         h_mask.reshape(-1), c_mask.reshape(-1)], axis=-1).astype(jnp.float32)
    if pad:
        packed = jnp.pad(packed, ((0, pad), (0, 0)))

    # ---- wrapper-side constant folding (weights are constants at inference) -
    def fold_branch(p):
        w1, b1 = p["w1"][0], p["b1"][0]                   # (H4,)
        g1, be1 = p["g1"][0], p["be1"][0]
        dw = w1 - jnp.mean(w1)
        db = b1 - jnp.mean(b1)
        vecs = jnp.stack([dw * g1, db * g1, be1])         # (3, H4)
        stats = jnp.stack([jnp.mean(dw * dw), jnp.mean(dw * db),
                           jnp.mean(db * db)])            # (3,)
        return vecs, stats

    hv, hs = fold_branch(hparams)
    cv, cs = fold_branch(cparams)
    branch_vecs = jnp.concatenate([hv, cv], axis=0).astype(jnp.float32)  # (6,H4)
    scalars = jnp.concatenate([hs, cs]).astype(jnp.float32)              # (6,)

    Wf = fusion["w"]                                       # (H, H)
    w_h = (hparams["w2"] @ Wf[:H2]).astype(jnp.bfloat16)   # (H4, H)
    w_c = (cparams["w2"] @ Wf[H2:]).astype(jnp.bfloat16)   # (H4, H)
    w_stacked = jnp.stack([w_h, w_c])                      # (2, H4, H) bf16
    fus_vecs = jnp.stack([
        hparams["b2"][0] @ Wf[:H2],      # branch-h bias through fusion weight
        cparams["b2"][0] @ Wf[H2:],      # branch-c bias through fusion weight
        fusion["b"][0],
        fusion["g"][0],
        fusion["be"][0],
    ]).astype(jnp.float32)                                 # (5, H)

    # ---- specs --------------------------------------------------------------
    row_spec = pl.BlockSpec((tm_eff, 4), lambda i: (i, 0))
    smem_spec = pl.BlockSpec(memory_space=pltpu.MemorySpace.SMEM)
    # Constant-index weight specs; TODO(synk): pipeline_mode=pl.Buffered(1)
    # would halve their VMEM footprint on v7x (64 MiB/TC) once verified.
    brv_spec = pl.BlockSpec(branch_vecs.shape, lambda i: (0, 0))
    w_spec = pl.BlockSpec(w_stacked.shape, lambda i: (0, 0, 0))
    fus_spec = pl.BlockSpec(fus_vecs.shape, lambda i: (0, 0))
    out_spec = pl.BlockSpec((tm_eff, H), lambda i: (i, 0))

    out = pl.pallas_call(
        nmr_encoder_kernel,
        out_shape=jax.ShapeDtypeStruct((n_pad, H), out_dtype),
        grid_spec=pltpu.PrefetchScalarGridSpec(
            num_scalar_prefetch=0,
            grid=(grid,),
            in_specs=[row_spec, smem_spec, brv_spec, w_spec, fus_spec],
            out_specs=out_spec,
        ),
        compiler_params=pltpu.CompilerParams(
            dimension_semantics=("parallel",),
            # fits v7x's 64 MiB/TC with headroom; v5e/v6e could go higher.
            vmem_limit_bytes=48 * 1024 * 1024,
        ),
    )(packed, scalars, branch_vecs, w_stacked, fus_vecs)

    if pad:
        out = out[:n_rows]
    return out.reshape(B, A, H)


def _reference(h_shifts, c_shifts, h_mask, c_mask, params, hidden_dim):
    """Plain-JAX (f32) reference for sanity checking."""
    hparams, cparams, fusion = params

    def branch(s, p):
        x = s[..., None] * p["w1"][0] + p["b1"][0]
        mu = x.mean(-1, keepdims=True)
        var = ((x - mu) ** 2).mean(-1, keepdims=True)
        x = (x - mu) / jnp.sqrt(var + LN_EPS) * p["g1"][0] + p["be1"][0]
        x = jnp.maximum(x, 0.0)
        return x @ p["w2"] + p["b2"][0]

    h = branch(h_shifts, hparams) * h_mask[..., None]
    c = branch(c_shifts, cparams) * c_mask[..., None]
    x = jnp.concatenate([h, c], axis=-1) @ fusion["w"] + fusion["b"][0]
    mu = x.mean(-1, keepdims=True)
    var = ((x - mu) ** 2).mean(-1, keepdims=True)
    x = (x - mu) / jnp.sqrt(var + LN_EPS) * fusion["g"][0] + fusion["be"][0]
    return jnp.maximum(x, 0.0)


if __name__ == "__main__":
    hidden_dim = 32
    B, A = 2, 8

    key = jax.random.PRNGKey(0)
    k_param, k_h, k_c, k_hm, k_cm = jax.random.split(key, 5)
    params = init_params(k_param, hidden_dim)

    h_shifts = jax.random.uniform(k_h, (B, A), jnp.float32, 0.0, 12.0)
    c_shifts = jax.random.uniform(k_c, (B, A), jnp.float32, 0.0, 200.0)
    h_mask = (jax.random.uniform(k_hm, (B, A)) > 0.3).astype(jnp.float32)
    c_mask = (jax.random.uniform(k_cm, (B, A)) > 0.3).astype(jnp.float32)

    out = nmr_encoder(h_shifts, c_shifts, h_mask, c_mask, params, hidden_dim)
    out = jax.block_until_ready(out)

    ref = _reference(h_shifts, c_shifts, h_mask, c_mask, params, hidden_dim)
    assert out.shape == (B, A, hidden_dim)
    assert out.dtype == jnp.bfloat16
    # bf16 MXU operands + bf16 output (f32 accumulation / LN) vs pure-f32 ref.
    assert jnp.allclose(out.astype(jnp.float32), ref, atol=5e-2, rtol=5e-2), \
        "mismatch vs reference"

    print("KERNEL_OK")
</pallas_src>

<mosaic_0001>
module attributes {stable_mosaic.version = 11 : i64} {
  func.func @nmr_encoder_kernel(%arg0: i32, %arg1: memref<8x4xf32, #tpu.memory_space<vmem>>, %arg2: memref<6xf32, #tpu.memory_space<smem>>, %arg3: memref<6x8xf32, #tpu.memory_space<vmem>>, %arg4: memref<2x8x32xbf16, #tpu.memory_space<vmem>>, %arg5: memref<5x32xf32, #tpu.memory_space<vmem>>, %arg6: memref<8x32xbf16, #tpu.memory_space<vmem>>) attributes {dimension_semantics = [#tpu.dimension_semantics<parallel>], iteration_bounds = array<i64: 2>, scalar_prefetch = 0 : i64, scratch_operands = 0 : i64, tpu.core_type = #tpu.core_type<tc>, window_params = [{transform_indices = @transform_0, window_bounds = array<i64: 8, 4>}, {transform_indices = @transform_1, window_bounds = array<i64: 6>}, {pipeline_mode = #tpu.pipeline_mode<synchronous>, transform_indices = @transform_2, window_bounds = array<i64: 6, 8>}, {pipeline_mode = #tpu.pipeline_mode<synchronous>, transform_indices = @transform_3, window_bounds = array<i64: 2, 8, 32>}, {pipeline_mode = #tpu.pipeline_mode<synchronous>, transform_indices = @transform_4, window_bounds = array<i64: 5, 32>}, {transform_indices = @transform_5, window_bounds = array<i64: 8, 32>}]} {
    %c0 = arith.constant 0 : index
    %c0_0 = arith.constant 0 : index
    %0 = vector.load %arg1[%c0, %c0_0] : memref<8x4xf32, #tpu.memory_space<vmem>>, vector<8x4xf32>
    %1 = vector.extract_strided_slice %0 {offsets = [0, 0], sizes = [8, 1], strides = [1, 1]} : vector<8x4xf32> to vector<8x1xf32>
    %2 = vector.extract_strided_slice %0 {offsets = [0, 1], sizes = [8, 1], strides = [1, 1]} : vector<8x4xf32> to vector<8x1xf32>
    %3 = vector.extract_strided_slice %0 {offsets = [0, 2], sizes = [8, 1], strides = [1, 1]} : vector<8x4xf32> to vector<8x1xf32>
    %4 = vector.extract_strided_slice %0 {offsets = [0, 3], sizes = [8, 1], strides = [1, 1]} : vector<8x4xf32> to vector<8x1xf32>
    %c0_1 = arith.constant 0 : index
    %c0_2 = arith.constant 0 : index
    %5 = vector.load %arg3[%c0_1, %c0_2] : memref<6x8xf32, #tpu.memory_space<vmem>>, vector<1x8xf32>
    %c1 = arith.constant 1 : index
    %c0_3 = arith.constant 0 : index
    %6 = vector.load %arg3[%c1, %c0_3] : memref<6x8xf32, #tpu.memory_space<vmem>>, vector<1x8xf32>
    %c2 = arith.constant 2 : index
    %c0_4 = arith.constant 0 : index
    %7 = vector.load %arg3[%c2, %c0_4] : memref<6x8xf32, #tpu.memory_space<vmem>>, vector<1x8xf32>
    %c0_5 = arith.constant 0 : index
    %8 = memref.load %arg2[%c0_5] : memref<6xf32, #tpu.memory_space<smem>>
    %c1_6 = arith.constant 1 : index
    %9 = memref.load %arg2[%c1_6] : memref<6xf32, #tpu.memory_space<smem>>
    %c2_7 = arith.constant 2 : index
    %10 = memref.load %arg2[%c2_7] : memref<6xf32, #tpu.memory_space<smem>>
    %11 = arith.mulf %1, %1 : vector<8x1xf32>
    %12 = vector.broadcast %8 : f32 to vector<8x1xf32>
    %13 = arith.mulf %11, %12 : vector<8x1xf32>
    %cst = arith.constant 2.000000e+00 : f32
    %14 = vector.broadcast %cst : f32 to vector<8x1xf32>
    %15 = arith.mulf %14, %1 : vector<8x1xf32>
    %16 = vector.broadcast %9 : f32 to vector<8x1xf32>
    %17 = arith.mulf %15, %16 : vector<8x1xf32>
    %18 = arith.addf %13, %17 : vector<8x1xf32>
    %19 = vector.broadcast %10 : f32 to vector<8x1xf32>
    %20 = arith.addf %18, %19 : vector<8x1xf32>
    %cst_8 = arith.constant 9.99999974E-6 : f32
    %21 = vector.broadcast %cst_8 : f32 to vector<8x1xf32>
    %22 = arith.addf %20, %21 : vector<8x1xf32>
    %23 = math.rsqrt %22 : vector<8x1xf32>
    %24 = vector.broadcast %1 : vector<8x1xf32> to vector<8x8xf32>
    %25 = vector.broadcast %5 : vector<1x8xf32> to vector<8x8xf32>
    %26 = arith.mulf %24, %25 : vector<8x8xf32>
    %27 = vector.broadcast %6 : vector<1x8xf32> to vector<8x8xf32>
    %28 = arith.addf %26, %27 : vector<8x8xf32>
    %29 = vector.broadcast %23 : vector<8x1xf32> to vector<8x8xf32>
    %30 = arith.mulf %28, %29 : vector<8x8xf32>
    %31 = vector.broadcast %7 : vector<1x8xf32> to vector<8x8xf32>
    %32 = arith.addf %30, %31 : vector<8x8xf32>
    %cst_9 = arith.constant 0.000000e+00 : f32
    %33 = vector.broadcast %cst_9 : f32 to vector<8x8xf32>
    %34 = arith.maximumf %32, %33 : vector<8x8xf32>
    %35 = vector.broadcast %3 : vector<8x1xf32> to vector<8x8xf32>
    %36 = arith.mulf %34, %35 : vector<8x8xf32>
    %c3 = arith.constant 3 : index
    %c0_10 = arith.constant 0 : index
    %37 = vector.load %arg3[%c3, %c0_10] : memref<6x8xf32, #tpu.memory_space<vmem>>, vector<1x8xf32>
    %c4 = arith.constant 4 : index
    %c0_11 = arith.constant 0 : index
    %38 = vector.load %arg3[%c4, %c0_11] : memref<6x8xf32, #tpu.memory_space<vmem>>, vector<1x8xf32>
    %c5 = arith.constant 5 : index
    %c0_12 = arith.constant 0 : index
    %39 = vector.load %arg3[%c5, %c0_12] : memref<6x8xf32, #tpu.memory_space<vmem>>, vector<1x8xf32>
    %c3_13 = arith.constant 3 : index
    %40 = memref.load %arg2[%c3_13] : memref<6xf32, #tpu.memory_space<smem>>
    %c4_14 = arith.constant 4 : index
    %41 = memref.load %arg2[%c4_14] : memref<6xf32, #tpu.memory_space<smem>>
    %c5_15 = arith.constant 5 : index
    %42 = memref.load %arg2[%c5_15] : memref<6xf32, #tpu.memory_space<smem>>
    %43 = arith.mulf %2, %2 : vector<8x1xf32>
    %44 = vector.broadcast %40 : f32 to vector<8x1xf32>
    %45 = arith.mulf %43, %44 : vector<8x1xf32>
    %cst_16 = arith.constant 2.000000e+00 : f32
    %46 = vector.broadcast %cst_16 : f32 to vector<8x1xf32>
    %47 = arith.mulf %46, %2 : vector<8x1xf32>
    %48 = vector.broadcast %41 : f32 to vector<8x1xf32>
    %49 = arith.mulf %47, %48 : vector<8x1xf32>
    %50 = arith.addf %45, %49 : vector<8x1xf32>
    %51 = vector.broadcast %42 : f32 to vector<8x1xf32>
    %52 = arith.addf %50, %51 : vector<8x1xf32>
    %cst_17 = arith.constant 9.99999974E-6 : f32
    %53 = vector.broadcast %cst_17 : f32 to vector<8x1xf32>
    %54 = arith.addf %52, %53 : vector<8x1xf32>
    %55 = math.rsqrt %54 : vector<8x1xf32>
    %56 = vector.broadcast %2 : vector<8x1xf32> to vector<8x8xf32>
    %57 = vector.broadcast %37 : vector<1x8xf32> to vector<8x8xf32>
    %58 = arith.mulf %56, %57 : vector<8x8xf32>
    %59 = vector.broadcast %38 : vector<1x8xf32> to vector<8x8xf32>
    %60 = arith.addf %58, %59 : vector<8x8xf32>
    %61 = vector.broadcast %55 : vector<8x1xf32> to vector<8x8xf32>
    %62 = arith.mulf %60, %61 : vector<8x8xf32>
    %63 = vector.broadcast %39 : vector<1x8xf32> to vector<8x8xf32>
    %64 = arith.addf %62, %63 : vector<8x8xf32>
    %cst_18 = arith.constant 0.000000e+00 : f32
    %65 = vector.broadcast %cst_18 : f32 to vector<8x8xf32>
    %66 = arith.maximumf %64, %65 : vector<8x8xf32>
    %67 = vector.broadcast %4 : vector<8x1xf32> to vector<8x8xf32>
    %68 = arith.mulf %66, %67 : vector<8x8xf32>
    %69 = arith.truncf %36 : vector<8x8xf32> to vector<8x8xbf16>
    %c0_19 = arith.constant 0 : index
    %c0_20 = arith.constant 0 : index
    %c0_21 = arith.constant 0 : index
    %70 = vector.load %arg4[%c0_19, %c0_20, %c0_21] : memref<2x8x32xbf16, #tpu.memory_space<vmem>>, vector<1x8x32xbf16>
    %71 = vector.shape_cast %70 : vector<1x8x32xbf16> to vector<8x32xbf16>
    %cst_22 = arith.constant dense<0.000000e+00> : vector<8x32xf32>
    %72 = tpu.matmul %69, %71, %cst_22 {dimension_numbers = #tpu.dot_dimension_numbers<[1], [0], [0], [1], [0, 0, 1, 1], [], []>} : vector<8x8xbf16>, vector<8x32xbf16>, vector<8x32xf32> -> vector<8x32xf32>
    %73 = arith.truncf %68 : vector<8x8xf32> to vector<8x8xbf16>
    %c1_23 = arith.constant 1 : index
    %c0_24 = arith.constant 0 : index
    %c0_25 = arith.constant 0 : index
    %74 = vector.load %arg4[%c1_23, %c0_24, %c0_25] : memref<2x8x32xbf16, #tpu.memory_space<vmem>>, vector<1x8x32xbf16>
    %75 = vector.shape_cast %74 : vector<1x8x32xbf16> to vector<8x32xbf16>
    %cst_26 = arith.constant dense<0.000000e+00> : vector<8x32xf32>
    %76 = tpu.matmul %73, %75, %cst_26 {dimension_numbers = #tpu.dot_dimension_numbers<[1], [0], [0], [1], [0, 0, 1, 1], [], []>} : vector<8x8xbf16>, vector<8x32xbf16>, vector<8x32xf32> -> vector<8x32xf32>
    %77 = arith.addf %72, %76 : vector<8x32xf32>
    %c0_27 = arith.constant 0 : index
    %c0_28 = arith.constant 0 : index
    %78 = vector.load %arg5[%c0_27, %c0_28] : memref<5x32xf32, #tpu.memory_space<vmem>>, vector<1x32xf32>
    %79 = vector.broadcast %3 : vector<8x1xf32> to vector<8x32xf32>
    %80 = vector.broadcast %78 : vector<1x32xf32> to vector<8x32xf32>
    %81 = arith.mulf %79, %80 : vector<8x32xf32>
    %82 = arith.addf %77, %81 : vector<8x32xf32>
    %c1_29 = arith.constant 1 : index
    %c0_30 = arith.constant 0 : index
    %83 = vector.load %arg5[%c1_29, %c0_30] : memref<5x32xf32, #tpu.memory_space<vmem>>, vector<1x32xf32>
    %84 = vector.broadcast %4 : vector<8x1xf32> to vector<8x32xf32>
    %85 = vector.broadcast %83 : vector<1x32xf32> to vector<8x32xf32>
    %86 = arith.mulf %84, %85 : vector<8x32xf32>
    %87 = arith.addf %82, %86 : vector<8x32xf32>
    %c2_31 = arith.constant 2 : index
    %c0_32 = arith.constant 0 : index
    %88 = vector.load %arg5[%c2_31, %c0_32] : memref<5x32xf32, #tpu.memory_space<vmem>>, vector<1x32xf32>
    %89 = vector.broadcast %88 : vector<1x32xf32> to vector<8x32xf32>
    %90 = arith.addf %87, %89 : vector<8x32xf32>
    %c3_33 = arith.constant 3 : index
    %c0_34 = arith.constant 0 : index
    %91 = vector.load %arg5[%c3_33, %c0_34] : memref<5x32xf32, #tpu.memory_space<vmem>>, vector<1x32xf32>
    %c4_35 = arith.constant 4 : index
    %c0_36 = arith.constant 0 : index
    %92 = vector.load %arg5[%c4_35, %c0_36] : memref<5x32xf32, #tpu.memory_space<vmem>>, vector<1x32xf32>
    %cst_37 = arith.constant dense<0.000000e+00> : vector<8xf32>
    %93 = vector.multi_reduction <add>, %90, %cst_37 [1] : vector<8x32xf32> to vector<8xf32>
    %94 = vector.shape_cast %93 : vector<8xf32> to vector<8x1xf32>
    %cst_38 = arith.constant 3.200000e+01 : f32
    %95 = vector.broadcast %cst_38 : f32 to vector<8x1xf32>
    %96 = arith.divf %94, %95 : vector<8x1xf32>
    %97 = vector.broadcast %96 : vector<8x1xf32> to vector<8x32xf32>
    %98 = arith.subf %90, %97 : vector<8x32xf32>
    %99 = arith.mulf %98, %98 : vector<8x32xf32>
    %cst_39 = arith.constant dense<0.000000e+00> : vector<8xf32>
    %100 = vector.multi_reduction <add>, %99, %cst_39 [1] : vector<8x32xf32> to vector<8xf32>
    %101 = vector.shape_cast %100 : vector<8xf32> to vector<8x1xf32>
    %cst_40 = arith.constant 3.200000e+01 : f32
    %102 = vector.broadcast %cst_40 : f32 to vector<8x1xf32>
    %103 = arith.divf %101, %102 : vector<8x1xf32>
    %104 = vector.broadcast %96 : vector<8x1xf32> to vector<8x32xf32>
    %105 = arith.subf %90, %104 : vector<8x32xf32>
    %cst_41 = arith.constant 9.99999974E-6 : f32
    %106 = vector.broadcast %cst_41 : f32 to vector<8x1xf32>
    %107 = arith.addf %103, %106 : vector<8x1xf32>
    %108 = math.rsqrt %107 : vector<8x1xf32>
    %109 = vector.broadcast %108 : vector<8x1xf32> to vector<8x32xf32>
    %110 = arith.mulf %105, %109 : vector<8x32xf32>
    %111 = vector.broadcast %91 : vector<1x32xf32> to vector<8x32xf32>
    %112 = arith.mulf %110, %111 : vector<8x32xf32>
    %113 = vector.broadcast %92 : vector<1x32xf32> to vector<8x32xf32>
    %114 = arith.addf %112, %113 : vector<8x32xf32>
    %cst_42 = arith.constant 0.000000e+00 : f32
    %115 = vector.broadcast %cst_42 : f32 to vector<8x32xf32>
    %116 = arith.maximumf %114, %115 : vector<8x32xf32>
    %117 = arith.truncf %116 : vector<8x32xf32> to vector<8x32xbf16>
    %c0_43 = arith.constant 0 : index
    %c0_44 = arith.constant 0 : index
    %118 = vector.load %arg6[%c0_43, %c0_44] : memref<8x32xbf16, #tpu.memory_space<vmem>>, vector<8x32xbf16>
    tpu.vector_store %arg6[%c0_43, %c0_44], %117 {strides = array<i32>} : memref<8x32xbf16, #tpu.memory_space<vmem>>, vector<8x32xbf16>,
    return
  }
  func.func @transform_0(%arg0: i32) -> (i32, i32) {
    %c0_i32 = arith.constant 0 : i32
    %c0_i32_0 = arith.constant 0 : i32
    return %arg0, %c0_i32 : i32, i32
  }
  func.func @transform_1(%arg0: i32) -> i32 {
    %c0_i32 = arith.constant 0 : i32
    %c0_i32_0 = arith.constant 0 : i32
    return %c0_i32 : i32
  }
  func.func @transform_2(%arg0: i32) -> (i32, i32) {
    %c0_i32 = arith.constant 0 : i32
    %c0_i32_0 = arith.constant 0 : i32
    %c0_i32_1 = arith.constant 0 : i32
    return %c0_i32, %c0_i32_0 : i32, i32
  }
  func.func @transform_3(%arg0: i32) -> (i32, i32, i32) {
    %c0_i32 = arith.constant 0 : i32
    %c0_i32_0 = arith.constant 0 : i32
    %c0_i32_1 = arith.constant 0 : i32
    %c0_i32_2 = arith.constant 0 : i32
    return %c0_i32, %c0_i32_0, %c0_i32_1 : i32, i32, i32
  }
  func.func @transform_4(%arg0: i32) -> (i32, i32) {
    %c0_i32 = arith.constant 0 : i32
    %c0_i32_0 = arith.constant 0 : i32
    %c0_i32_1 = arith.constant 0 : i32
    return %c0_i32, %c0_i32_0 : i32, i32
  }
  func.func @transform_5(%arg0: i32) -> (i32, i32) {
    %c0_i32 = arith.constant 0 : i32
    %c0_i32_0 = arith.constant 0 : i32
    return %arg0, %c0_i32 : i32, i32
  }
}

</mosaic_0001>

<bundles_post_ra>
// kernel: nmr_encoder.1
= control target key start
LH: loop header
LB: loop body
LE: loop exit
PB: predicated region body
PF: predicated region fallthrough
CT: control target
= control target key end

     0   :  { %10 = vsyncpa [#allocation4], 0  ;;  %s864_s0 = inlined_call_operand.vmem [shape: f32[16,4], index: 0, kind: input, shape index: {}]   ;;  %s865_s1 = inlined_call_operand.vmem [shape: f32[6], index: 1, kind: input, shape index: {}]   ;;  %s866_s2 = inlined_call_operand.vmem [shape: f32[6,8], index: 2, kind: input, shape index: {}]   ;;  %s867_s3 = inlined_call_operand.vmem [shape: bf16[2,8,32], index: 3, kind: input, shape index: {}]   ;;  %s868_s4 = inlined_call_operand.vmem [shape: f32[5,32], index: 4, kind: input, shape index: {}]   ;;  %s869_s5 = inlined_call_operand.hbm [shape: bf16[16,32], index: 5, kind: output, shape index: {}]  }
   0x1   :  { %11 = vsyncpa [#allocation3], 0 }
   0x2   :  { %13 = vsyncpa [#allocation3 + $0x1], 0  ;;  %s734_s18 = smov 0   ;;  %s736_s19 = smov 0  }
   0x3   :  { %s738_s20 = smov 0   ;;  %s740_s21 = smov 0  }
   0x4 LB: > { %s755_s22 = sadd.s32 4294967295, %s696_s21   ;;  %s514_s23 = sadd.s32 4294967294, %s696_s21   ;;  %s696_s21 = sphi %s740_s21, %s875_s21   ;;  %s692_s20 = sphi %s738_s20, %s874_s20   ;;  %s688_s19 = sphi %s736_s19, %s873_s19   ;;  %s684_s18 = sphi %s734_s18, %s872_s18  }
   0x5   : > { %s759_s24 = sadd.s32 1, %s696_s21   ;;  %s136_s25 = sadd.s32 1, %s692_s20 }
   0x6   : > { %s133_s26 = ssub.s32 %s696_s21, %s759_s24  ;;  %p146_p0 = scmp.ne.s32.totalorder %s692_s20, %s688_s19 }
   0x7   : > { %p134_p1 = scmp.eq.s32.totalorder %s133_s26, 0  ;;  %p147_p2 = scmp.eq.s32.totalorder %s755_s22, 1 }
   0x8   : > { %p152_p3 = scmp.ne.s32.totalorder %s688_s19, %s684_s18  ;;  %p153_p4 = scmp.eq.s32.totalorder %s514_s23, 1 }
   0x9   : > { %s770_s27 = scalar_select %p134_p1, %s692_s20, %s136_s25  }
   0xa   : > { %p772_p5 = por %p147_p2, %p146_p0  ;;  %p776_p6 = por %p153_p4, %p152_p3 }
   0xb   : > { %p515_p7 = scmp.ge.s32.totalorder %s696_s21, 1  ;;  %p160_p8 = scmp.lt.s32.totalorder %s696_s21, 3 }
   0xc   : > { %p548_p9 = scmp.eq.s32.totalorder %s755_s22, 0  ;;  %s172_s7 = sshll.u32 %s865_s1, 4  ;;  %s173_s7 = int_to_ptr.vmem [resolvable:$true] %s172_s7 }
   0xd   : > { %p161_p10 = pnand %p515_p7, %p160_p8  ;;  %s698_s8 = smov [#allocation2]  }
   0xf   : > { %p540_p11 = pneg %p161_p10  ;;  %201 = sbr.rel (%p161_p10) target bundleno = 601 (0x259), region = 40 }
  0x11   : > { %p541_p12 = pnand %p548_p9, %p540_p11 }
  0x13   : > { %543 = dma.vmem_to_smem (!%p541_p12), %s173_s7, 16, %s698_s8, [#allocation4]  }
  0x14   : > { %675 = dma.done.wait (%p548_p9), [#allocation4], 16  }
  0x15   : > { %677 = vsyncadd (%p548_p9), [#allocation4], 4294967280 }
  0x16   : > { %208 = sfence }
  0x17   : > { %p230_p13 = scmp.lt.s32.totalorder %s755_s22, 1  ;;  %s239_s9 = sld [smem:[#allocation2]]  ;;  %v699_v0 = vmov 0   ;;  %v700_v16 = vmov 2   ;;  %v701_v19 = vmov 1   ;;  %v702_v22 = vmov 3  }
  0x18   : > { %589 = vset.pattern.permute.xlu0 %v699_v0  ;;  %591 = vset.pattern.permute.xlu1 %v699_v0  ;;  %s522_s10 = sld [smem:[#allocation2 + $0x1]]  ;;  %v332_v37 = vld [vmem:[%s867_s3] sm:$0xf]  ;;  %vm340_vm6 = vcmask 1043456   ;;  %v527_v39 = vld [vmem:[%s867_s3 + $0x4] sm:$0xf] }
  0x19   : > { %s231_s11 = scalar_select %p230_p13, %s755_s22, 1  ;;  %593 = vset.pattern.permute.xlu2 %v700_v16  ;;  %v361_v38 = vsel %vm340_vm6, %v332_v37, 0  ;;  %v342_v40 = vsel %vm340_vm6, %v527_v39, 0  ;;  %v596_v41 = vld [vmem:[%s866_s2] ss:$0 sm:$0xff]  ;;  %vm336_vm7 = vcmask 64512  }
  0x1a   : > { %s523_s12 = sld [smem:[#allocation2 + $0x2]]  ;;  %370 = vmatpush.bf16.msra.mxu1 %v361_v38  ;;  %351 = vmatpush.bf16.msra.mxu0 %v342_v40  ;;  %v597_v44 = vld [vmem:[%s866_s2 + $0x1] ss:$0 sm:$0xff]  ;;  %v599_v46 = vld [vmem:[%s866_s2 + $0x3] ss:$0 sm:$0xff]  ;;  %vm389_vm8 = vcmask 261120  }
  0x1b   : > { %s521_s13 = sshll.u32 %s231_s11, 3  ;;  %s524_s14 = sld [smem:[#allocation2 + $0x3]]  ;;  %v598_v47 = vld [vmem:[%s866_s2 + $0x2] ss:$0 sm:$0xff]  ;;  %v601_v52 = vld [vmem:[%s866_s2 + $0x4] ss:$0 sm:$0xff] }
  0x1c   : > { %s233_s17 = scalar_lea.vmem %s864_s0, %s521_s13  ;;  %s525_s23 = sld [smem:[#allocation2 + $0x4]]  ;;  %v602_v58 = vld [vmem:[%s866_s2 + $0x5] ss:$0 sm:$0xff]  ;;  %v605_v38 = vld [vmem:[%s868_s4 + $0x3] ss:$0 sm:$0xff]  ;;  %vm425_vm13 = vcmask 257024  }
  0x1d   : > { %v235_v1 = vld [vmem:[%s233_s17] sm:$0xff]  ;;  %v243_v2 = vstv %s239_s9  ;;  %s526_s25 = sld [smem:[#allocation2 + $0x5]] }
  0x1e   : > { %264 = vperm.xlu0 %589, %v235_v1   ;;  %v242_v3 = vmul.f32 %v235_v1, %v235_v1  ;;  %v245_v4 = vmul.f32 2.0, %v235_v1  ;;  %v246_v5 = vstv %s522_s10  ;;  %281 = vperm.xlu2 %593, %v235_v1   ;;  %s227_s10 = sand.u32 1, %s688_s19  }
  0x1f   : > { %s520_s13 = sshll.u32 %s227_s10, 2 }
  0x20   : > { %v244_v6 = vmul.f32 %v243_v2, %v242_v3  ;;  %v247_v7 = vmul.f32 %v246_v5, %v245_v4  ;;  %v249_v8 = vstv %s523_s12  ;;  %v603_v5 = vld [vmem:[%s868_s4 + $0x1] ss:$0 sm:$0xff]  ;;  %s229_s26 = scalar_lea.vmem [#allocation5], %s520_s13  ;;  %s650_s12 = scalar_lea.hbm %s869_s5, 8 }
  0x21   : > { %v291_v9 = vstv %s524_s14  ;;  %s531_s14 = sshll.u32 %s755_s22, 2  ;;  %s440_s30 = sshll.u32 %s229_s26, 4  ;;  %s441_s30 = int_to_ptr.vmem [resolvable:$true] %s440_s30 }
  0x22   : > { %v248_v10 = vadd.f32 %v247_v7, %v244_v6  ;;  %v292_v11 = vmul.f32 %v291_v9, %v242_v3  ;;  %v293_v12 = vstv %s525_s23  ;;  %s428_s22 = scalar_lea.sflag [#allocation3], %s227_s10 }
  0x23   : > { %v294_v13 = vmul.f32 %v293_v12, %v245_v4  ;;  %v296_v15 = vstv %s526_s25  ;;  %v600_v4 = vld [vmem:[%s868_s4] ss:$0 sm:$0xff]  ;;  %v604_v12 = vld [vmem:[%s868_s4 + $0x2] ss:$0 sm:$0xff]  ;;  %s438_s25 = scalar_lea.hbm %s869_s5, %s531_s14 }
  0x24   : > { %v250_v14 = vadd.f32 %v249_v8, %v248_v10  ;;  %s442_s6 = sshll.u32 %s438_s25, 4  ;;  %s443_s6 = int_to_ptr.hbm [resolvable:$true] %s442_s6 }
  0x25   : > { %v295_v17 = vadd.f32 %v294_v13, %v292_v11  ;;  %s644_s7 = sshra.s32 %s443_s6, 4  ;;  %s645_s7 = int_to_ptr.hbm [resolvable:$true] %s644_s7 }
  0x26   : > { %v251_v18 = vadd.f32 1e-05, %v250_v14  ;;  %590 = vset.pattern.permute.xlu0 %v701_v19  ;;  %594 = vset.pattern.permute.xlu2 %v702_v22  ;;  %s646_s8 = scalar_lea.hbm %s645_s7, 4  ;;  %p651_p3 = scmp.lt.s32.totalorder %s645_s7, %s869_s5 }
  0x27   : > { %310 = vperm.xlu0 %590, %v235_v1   ;;  %v297_v20 = vadd.f32 %v296_v15, %v295_v17  ;;  %327 = vperm.xlu2 %594, %v235_v1   ;;  %v703_v17 = vmov 32.0   ;;  %p647_p0 = scmp.ne.s32.totalorder %s645_s7, %s646_s8  ;;  %p652_p4 = scmp.lt.s32.totalorder %s650_s12, %s646_s8 }
  0x28   : > { %607 = vrsqrt.f32 %v251_v18  ;;  %vm258_vm0 = vweird.f32 %v251_v18 }
  0x29   : > { %v298_v21 = vadd.f32 1e-05, %v297_v20  ;;  %p648_p1 = pnand %p647_p0, %p772_p5  ;;  %p653_p7 = por %p652_p4, %p651_p3 }
  0x2b   : > { %609 = vrsqrt.f32 %v298_v21  ;;  %vm305_vm3 = vweird.f32 %v298_v21  ;;  %p649_p2 = pneg %p648_p1 }
  0x2c   : > { %611 = vrcp.f32 %v703_v17 }
  0x2d   : > { %p654_p8 = pnand %p653_p7, %p649_p2 }
  0x2e   : > { %v608_v23 = vpop.eup %607 }
  0x2f   : > { %v253_v24 = vmul.f32 %v608_v23, %v251_v18  ;;  %595 = vset.pattern.permute.xlu0 %v702_v22  ;;  %vm259_vm1 = vweird.f32 %v608_v23 }
  0x30   : > { %vm260_vm2 = vmor %vm258_vm0, %vm259_vm1 }
  0x31   : > { %v610_v25 = vpop.eup %609  ;;  %v254_v26 = vmul.f32 %v608_v23, %v253_v24 }
  0x32   : > { %v300_v27 = vmul.f32 %v610_v25, %v298_v21  ;;  %vm306_vm4 = vweird.f32 %v610_v25  ;;  %v612_v18 = vpop.eup %611 }
  0x33   : > { %v255_v28 = vmul.f32 0.5, %v254_v26  ;;  %vm307_vm5 = vmor %vm305_vm3, %vm306_vm4  ;;  %vm398_vm9 = vweird.f32 %v612_v18 }
  0x34   : > { %v301_v29 = vmul.f32 %v610_v25, %v300_v27 }
  0x35   : > { %v256_v30 = vsub.f32 1.5, %v255_v28 }
  0x36   : > { %v302_v31 = vmul.f32 0.5, %v301_v29 }
  0x37   : > { %v257_v32 = vmul.f32 %v608_v23, %v256_v30 }
  0x38   : > { %v303_v33 = vsub.f32 1.5, %v302_v31 }
  0x39   : > { %v261_v34 = vsel %vm260_vm2, %v608_v23, %v257_v32 }
  0x3a   : > { %273 = vperm.xlu1 %591, %v261_v34   ;;  %v304_v35 = vmul.f32 %v610_v25, %v303_v33 }
  0x3c   : > { %v308_v36 = vsel %vm307_vm5, %v610_v25, %v304_v35 }
  0x42   : > { %592 = vset.pattern.permute.xlu1 %v701_v19  ;;  %v394_v19 = vmul.f32 32.0, %v612_v18 }
  0x43   : > { %319 = vperm.xlu1 %592, %v308_v36  }
  0x44   : > { %v395_v20 = vsub.f32 1.0, %v394_v19 }
  0x46   : > { %v396_v21 = vmul.f32 %v612_v18, %v395_v20 }
  0x48   : > { %v397_v22 = vadd.f32 %v612_v18, %v396_v21 }
  0x4a   : > { %v399_v23 = vsel %vm398_vm9, %v612_v18, %v397_v22 }
  0x78   : > { %v282_v54 = vpop.permute.xlu2 %281 }
  0x79   : > { %v378_v8 = vmul.f32 %v600_v4, %v282_v54 }
  0x81   : > { %v328_v63 = vpop.permute.xlu2 %327 }
  0x82   : > { %v382_v10 = vmul.f32 %v603_v5, %v328_v63 }
  0x90   : > { %v265_v42 = vpop.permute.xlu0 %264 }
  0x91   : > { %v268_v43 = vmul.f32 %v596_v41, %v265_v42  ;;  %v606_v41 = vld [vmem:[%s868_s4 + $0x4] ss:$0 sm:$0xff] }
  0x93   : > { %v270_v45 = vadd.f32 %v597_v44, %v268_v43 }
  0x99   : > { %v311_v48 = vpop.permute.xlu0 %310 }
  0x9a   : > { %v314_v51 = vmul.f32 %v599_v46, %v311_v48 }
  0x9c   : > { %v316_v56 = vadd.f32 %v601_v52, %v314_v51 }
  0xac   : > { %v274_v49 = vpop.permute.xlu1 %273 }
  0xad   : > { %v276_v50 = vmul.f32 %v274_v49, %v270_v45 }
  0xaf   : > { %v278_v53 = vadd.f32 %v598_v47, %v276_v50 }
  0xb1   : > { %v279_v55 = vmax.f32 %v278_v53, 0.0 }
  0xb3   : > { %v284_v57 = vmul.f32 %v282_v54, %v279_v55 }
  0xb5   : > { %v331_v59 = vpack.c.bf16 %v284_v57, %v284_v57  ;;  %v320_v60 = vpop.permute.xlu1 %319 }
  0xb6   : > { %v322_v61 = vmul.f32 %v320_v60, %v316_v56 }
  0xb7   : > { %529 = vmatmul.msk.bf16.vlgmr.msra.gmra.mxu1 %vm336_vm7, %v331_v59 }
  0xb8   : > { %v324_v62 = vadd.f32 %v602_v58, %v322_v61 }
  0xba   : > { %v325_v0 = vmax.f32 %v324_v62, 0.0 }
  0xbc   : > { %v330_v1 = vmul.f32 %v328_v63, %v325_v0 }
  0xbe   : > { %v333_v2 = vpack.c.bf16 %v330_v1, %v330_v1 }
  0xc0   : > { %528 = vmatmul.msk.bf16.vlgmr.msra.gmra.mxu0 %vm336_vm7, %v333_v2 }
 0x134   : > { %v372_v3 = vpop.f32.mrf.mxu1 }
 0x13c   : > { %v374_v6 = vpop.f32.mrf.mxu1 }
 0x13d   : > { %v353_v7 = vpop.f32.mrf.mxu0 }
 0x13e   : > { %v373_v9 = vadd.f32 %v372_v3, %v353_v7 }
 0x140   : > { %v379_v11 = vadd.f32 %v378_v8, %v373_v9 }
 0x142   : > { %v383_v13 = vadd.f32 %v382_v10, %v379_v11 }
 0x144   : > { %v386_v14 = vadd.f32 %v604_v12, %v383_v13 }
 0x145   : > { %v355_v15 = vpop.f32.mrf.mxu0 }
 0x146   : > { %v390_v16 = vsel %vm389_vm8, %v386_v14, 0.0 }
 0x147   : > { %391 = vadd.xlane.f32.xlu1 %v390_v16 }
 0x1ba   : > { %v392_v24 = vpop.xlane.xlu1 %391 }
 0x1bb   : > { %v400_v25 = vmul.f32 %v399_v23, %v392_v24 }
 0x1bd   : > { %v401_v26 = vsub.f32 %v386_v14, %v400_v25 }
 0x1bf   : > { %v402_v27 = vmul.f32 %v401_v26, %v401_v26 }
 0x1c1   : > { %v403_v28 = vsel %vm389_vm8, %v402_v27, 0.0 }
 0x1c2   : > { %404 = vadd.xlane.f32.xlu2 %v403_v28 }
 0x235   : > { %v405_v29 = vpop.xlane.xlu2 %404 }
 0x236   : > { %v406_v30 = vmul.f32 %v405_v29, %v399_v23 }
 0x238   : > { %v407_v31 = vadd.f32 1e-05, %v406_v30 }
 0x23a   : > { %613 = vrsqrt.f32 %v407_v31  ;;  %vm414_vm11 = vweird.f32 %v407_v31 }
 0x240   : > { %v614_v32 = vpop.eup %613 }
 0x241   : > { %v409_v33 = vmul.f32 %v614_v32, %v407_v31  ;;  %vm415_vm10 = vweird.f32 %v614_v32 }
 0x242   : > { %vm416_vm12 = vmor %vm414_vm11, %vm415_vm10 }
 0x243   : > { %v410_v34 = vmul.f32 %v614_v32, %v409_v33 }
 0x245   : > { %v411_v35 = vmul.f32 0.5, %v410_v34 }
 0x247   : > { %v412_v36 = vsub.f32 1.5, %v411_v35 }
 0x249   : > { %v413_v37 = vmul.f32 %v614_v32, %v412_v36 }
 0x24b   : > { %v417_v39 = vsel %vm416_vm12, %v614_v32, %v413_v37 }
 0x24c   : > { %v418_v40 = vmul.f32 %v417_v39, %v401_v26 }
 0x24e   : > { %v420_v42 = vmul.f32 %v605_v38, %v418_v40 }
 0x250   : > { %v422_v43 = vadd.f32 %v606_v41, %v420_v42 }
 0x252   : > { %v423_v44 = vmax.f32 %v422_v43, 0.0 }
 0x254   : > { %v424_v45 = vpack.c.bf16 %v423_v44, %v423_v44 }
 0x256   : > { %426 = vst.msk [vmem:[%s229_s26] sm:$0xf] %vm425_vm13, %v424_v45 }
 0x257   : > { %657 = shalt.err (!%p654_p8)
}
 0x258   : > { %538 = dma.vmem_to_hbm [thread:$0]  (%p772_p5), %s441_s30, 64, %s443_s6, %s428_s22  }
 0x259 PF: > { %p550_p9 = scmp.ge.s32.totalorder %s696_s21, 2  ;;  %s454_s10 = sand.u32 1, %s684_s18  }
 0x25a   : > { %s455_s15 = scalar_lea.sflag [#allocation3], %s454_s10 }
 0x25b   : > { %p545_p10 = pnand %p550_p9, %p776_p6 }
 0x25d   : > { %p546_p11 = pneg %p545_p10 }
 0x25f   : > { %679 = dma.done.wait (%p546_p11), %s455_s15, 64  }
 0x260   : > { %681 = vsyncadd (%p546_p11), %s455_s15, 4294967232  ;;  %p16_p12 = scmp.ge.s32.totalorder %s759_s24, 4   ;;  %s872_s18 = smov %s688_s19 }
 0x261   : > { %s873_s19 = smov %s692_s20  ;;  %s874_s20 = smov %s770_s27 }
 0x262   : > { %s875_s21 = smov %s759_s24  ;;  %18 = sbr.rel (!%p16_p12) target bundleno = 4 (0x4), region = 81 }
 0x267   :  { %461 = vsyncpa [#allocation3], 1 }
 0x268   :  { %463 = vsyncpa [#allocation3 + $0x1], 1 }
 0x269   :  { %464 = vsyncpa [#allocation4], 1 }
 0x26a   :  { %466 = vsyncpa [#allocation4 + $0x1], 1 }

</bundles_post_ra>
